<compile_context>
chip_gen: v7x
topology: tpu7x:2x2x1
jax: 0.10.0
libtpu: 0.0.40
codegen_flags: <defaults>
</compile_context>

<pallas_src>
import functools

import jax
import jax.numpy as jnp
from jax import lax
from jax.experimental import pallas as pl
from jax.experimental.pallas import tpu as pltpu

_MIB = 1024 * 1024


def _vmem_capacity_bytes():
    """Per-core VMEM capacity, generation-aware (v5e/v6e 128 MiB, v7x 64 MiB)."""
    try:
        cap = int(pltpu.get_tpu_info().vmem_capacity_bytes)
        if cap > 0:
            return cap
    except Exception:
        pass
    return 64 * _MIB  # conservative default (v7x per-TensorCore)


def _largest_divisor_at_most(n, limit):
    limit = max(1, min(int(n), int(limit)))
    for d in range(limit, 0, -1):
        if n % d == 0:
            return d
    return 1


def _largest_aligned_divisor_at_most(total, align, limit):
    """Largest d with d | total, align | d and d <= max(limit, align)."""
    best = align
    d = align
    hi = min(int(total), max(int(limit), align))
    while d <= hi:
        if total % d == 0:
            best = d
        d += align
    return best


# ---------------------------------------------------------------------------
# Single-pass fused kernel: one grid step normalizes Bn*Bg whole groups.
# ---------------------------------------------------------------------------
def _gn_fused_kernel(x_ref, w_ref, b_ref, o_ref, *, eps, inv_count,
                     hw_valid, hw_padded):
    # x_ref: (Bn, Bg, Cg, HWp) lane-dense tile; w_ref/b_ref: (Bg, Cg, 1).
    x = x_ref[...]
    xf = x.astype(jnp.float32)

    # Per-group mean (padded lanes hold zeros and contribute nothing).
    s = jnp.sum(jnp.sum(xf, axis=3, keepdims=True), axis=2, keepdims=True)
    mean = s * inv_count                                      # (Bn, Bg, 1, 1)

    # Centered second pass for the variance: the tile is VMEM/vreg resident so
    # the re-read is nearly free and it avoids E[x^2]-E[x]^2 cancellation.
    centered = xf - mean
    if hw_valid != hw_padded:
        lane = lax.broadcasted_iota(jnp.int32, (1, 1, 1, hw_padded), 3)
        centered = jnp.where(lane < hw_valid, centered, 0.0)
    ss = jnp.sum(jnp.sum(centered * centered, axis=3, keepdims=True),
                 axis=2, keepdims=True)
    inv = lax.rsqrt(ss * inv_count + eps)                     # (Bn, Bg, 1, 1)

    # Fused normalize + affine, computed in f32 (matches PyTorch numerics;
    # this op is HBM-bound so the wider VPU math is free), cast at the store.
    w = w_ref[...].astype(jnp.float32)[None]                  # (1, Bg, Cg, 1)
    b = b_ref[...].astype(jnp.float32)[None]
    o_ref[...] = (centered * (w * inv) + b).astype(o_ref.dtype)


# ---------------------------------------------------------------------------
# Two-phase fallback kernels (group tile too large to keep VMEM-resident).
# ---------------------------------------------------------------------------
def _gn_stats_kernel(x_ref, s_ref, ss_ref):
    # x_ref: (1, 1, Cg, Thw).  Accumulate per-group sum / sum-of-squares along
    # the spatial grid axis (innermost, "arbitrary").
    @pl.when(pl.program_id(2) == 0)
    def _():
        s_ref[...] = jnp.zeros_like(s_ref)
        ss_ref[...] = jnp.zeros_like(ss_ref)

    xf = x_ref[...].astype(jnp.float32)
    s_ref[...] += jnp.sum(jnp.sum(xf, axis=3, keepdims=True),
                          axis=2, keepdims=True)
    ss_ref[...] += jnp.sum(jnp.sum(xf * xf, axis=3, keepdims=True),
                           axis=2, keepdims=True)


def _gn_apply_kernel(x_ref, scale_ref, shift_ref, o_ref):
    xf = x_ref[...].astype(jnp.float32)
    o_ref[...] = (xf * scale_ref[...] + shift_ref[...]).astype(o_ref.dtype)


# ---------------------------------------------------------------------------
# Wrapper
# ---------------------------------------------------------------------------
def group_norm(x, weight, bias, num_groups, eps=1e-5, *,
               vmem_budget_bytes=None, target_tile_bytes=2 * _MIB):
    """GroupNorm forward.

    x:      (N, C, H, W)
    weight: (1, C, 1, 1)   (PyTorch parameter shape)
    bias:   (1, C, 1, 1)
    """
    N, C, H, W = x.shape
    G = int(num_groups)
    assert C % G == 0, "Number of channels must be divisible by number of groups"
    Cg = C // G
    HW = H * W
    HWp = ((HW + 127) // 128) * 128          # lane-dense last dim
    itemsize = jnp.dtype(x.dtype).itemsize

    # Lane-dense layout; reshape is free, optional zero-pad keeps stores
    # unmasked and does not perturb the statistics.
    x_r = x.reshape(N, G, Cg, HW)
    if HWp != HW:
        x_r = jnp.pad(x_r, ((0, 0), (0, 0), (0, 0), (0, HWp - HW)))
    w_r = jnp.asarray(weight).reshape(G, Cg, 1)
    b_r = jnp.asarray(bias).reshape(G, Cg, 1)

    hw_cap = int(_vmem_capacity_bytes() * 0.8)   # headroom below physical VMEM
    budget = int(vmem_budget_bytes) if vmem_budget_bytes is not None else hw_cap

    group_bytes = Cg * HWp * itemsize
    group_f32 = Cg * HWp * 4
    inv_count = 1.0 / float(Cg * HW)

    def _single_pass_est(bn, bg):
        ng = bn * bg
        # in+out double-buffered + ~3 live f32 full-tile temporaries + slack.
        return 4 * ng * group_bytes + 3 * ng * group_f32 + _MIB

    if _single_pass_est(1, 1) <= budget:
        # ------------------------- single-pass fused path -------------------
        target = max(group_bytes,
                     min(int(target_tile_bytes), max(budget // 6, group_bytes)))
        bg = _largest_divisor_at_most(G, target // group_bytes)
        bn = 1
        if bg == G:
            bn = _largest_divisor_at_most(N, target // (G * group_bytes))

        vmem_limit = int(min(max(_single_pass_est(bn, bg), 16 * _MIB), hw_cap))
        kernel = functools.partial(
            _gn_fused_kernel, eps=float(eps), inv_count=inv_count,
            hw_valid=HW, hw_padded=HWp)

        out_p = pl.pallas_call(
            kernel,
            out_shape=jax.ShapeDtypeStruct((N, G, Cg, HWp), x.dtype),
            grid_spec=pltpu.PrefetchScalarGridSpec(
                num_scalar_prefetch=0,
                # group-blocks outer, sample-blocks inner: affine-param blocks
                # keep the same index across the inner loop -> no re-DMA.
                grid=(G // bg, N // bn),
                in_specs=[
                    pl.BlockSpec((bn, bg, Cg, HWp), lambda g, n: (n, g, 0, 0)),
                    pl.BlockSpec((bg, Cg, 1), lambda g, n: (g, 0, 0)),
                    pl.BlockSpec((bg, Cg, 1), lambda g, n: (g, 0, 0)),
                ],
                out_specs=pl.BlockSpec((bn, bg, Cg, HWp),
                                       lambda g, n: (n, g, 0, 0)),
            ),
            compiler_params=pltpu.CompilerParams(
                dimension_semantics=("parallel", "parallel"),
                vmem_limit_bytes=vmem_limit,
            ),
        )(x_r, w_r, b_r)
    else:
        # --------------------- two-phase fallback path ----------------------
        # TODO(synk): also tile Cg if a single (Cg, 128) slab ever exceeds VMEM.
        thw_bytes_target = max(Cg * 128 * itemsize, min(budget // 4, 2 * _MIB))
        thw = _largest_aligned_divisor_at_most(
            HWp, 128, max(128, thw_bytes_target // (Cg * itemsize)))
        n_hw = HWp // thw

        tile_bytes = Cg * thw * itemsize
        est_fb = 4 * tile_bytes + 3 * Cg * thw * 4 + _MIB
        vmem_fb = int(min(max(est_fb, 16 * _MIB), hw_cap))

        # Pass 1: per-group sum / sum-of-squares (zero padding is harmless).
        s, ss = pl.pallas_call(
            _gn_stats_kernel,
            out_shape=(jax.ShapeDtypeStruct((N, G, 1, 1), jnp.float32),
                       jax.ShapeDtypeStruct((N, G, 1, 1), jnp.float32)),
            grid_spec=pltpu.PrefetchScalarGridSpec(
                num_scalar_prefetch=0,
                grid=(N, G, n_hw),
                in_specs=[pl.BlockSpec((1, 1, Cg, thw),
                                       lambda n, g, h: (n, g, 0, h))],
                out_specs=(pl.BlockSpec((1, 1, 1, 1),
                                        lambda n, g, h: (n, g, 0, 0)),
                           pl.BlockSpec((1, 1, 1, 1),
                                        lambda n, g, h: (n, g, 0, 0))),
            ),
            compiler_params=pltpu.CompilerParams(
                dimension_semantics=("parallel", "parallel", "arbitrary"),
                vmem_limit_bytes=vmem_fb,
            ),
        )(x_r)

        mean = s * inv_count                                    # (N, G, 1, 1)
        var = jnp.maximum(ss * inv_count - mean * mean, 0.0)    # clamp >= 0
        inv = lax.rsqrt(var + eps)
        wf = w_r.astype(jnp.float32).reshape(1, G, Cg, 1)
        bf = b_r.astype(jnp.float32).reshape(1, G, Cg, 1)
        scale = wf * inv                                        # (N, G, Cg, 1)
        shift = bf - mean * scale                               # (N, G, Cg, 1)

        # Pass 2: normalize + affine.
        out_p = pl.pallas_call(
            _gn_apply_kernel,
            out_shape=jax.ShapeDtypeStruct((N, G, Cg, HWp), x.dtype),
            grid_spec=pltpu.PrefetchScalarGridSpec(
                num_scalar_prefetch=0,
                grid=(N, G, n_hw),
                in_specs=[
                    pl.BlockSpec((1, 1, Cg, thw), lambda n, g, h: (n, g, 0, h)),
                    pl.BlockSpec((1, 1, Cg, 1), lambda n, g, h: (n, g, 0, 0)),
                    pl.BlockSpec((1, 1, Cg, 1), lambda n, g, h: (n, g, 0, 0)),
                ],
                out_specs=pl.BlockSpec((1, 1, Cg, thw),
                                       lambda n, g, h: (n, g, 0, h)),
            ),
            compiler_params=pltpu.CompilerParams(
                dimension_semantics=("parallel", "parallel", "parallel"),
                vmem_limit_bytes=vmem_fb,
            ),
        )(x_r, scale, shift)

    return out_p[..., :HW].reshape(N, C, H, W)


def group_norm_ref(x, weight, bias, num_groups, eps=1e-5):
    N, C, H, W = x.shape
    G = num_groups
    xg = x.reshape(N, G, -1).astype(jnp.float32)
    mean = jnp.mean(xg, axis=2, keepdims=True)
    var = jnp.mean((xg - mean) ** 2, axis=2, keepdims=True)
    xn = ((xg - mean) / jnp.sqrt(var + eps)).reshape(N, C, H, W)
    w = jnp.asarray(weight).reshape(1, C, 1, 1).astype(jnp.float32)
    b = jnp.asarray(bias).reshape(1, C, 1, 1).astype(jnp.float32)
    return (xn * w + b).astype(x.dtype)


if __name__ == "__main__":
    # Case 1: H*W a multiple of 128 -> fused single-pass path, no padding.
    N, C, H, W, G = 2, 4, 16, 16, 2
    key = jax.random.PRNGKey(0)
    x = jax.random.normal(key, (N, C, H, W), dtype=jnp.float32)
    weight = jnp.ones((1, C, 1, 1), dtype=jnp.float32)   # nn.Parameter(torch.ones)
    bias = jnp.zeros((1, C, 1, 1), dtype=jnp.float32)    # nn.Parameter(torch.zeros)

    out = jax.block_until_ready(group_norm(x, weight, bias, num_groups=G))
    ref = group_norm_ref(x, weight, bias, num_groups=G)
    assert out.shape == (N, C, H, W)
    assert jnp.allclose(out, ref, atol=1e-5, rtol=1e-5), "case 1 mismatch"

    # Case 2: H*W not a multiple of 128 -> exercises lane zero-padding + mask,
    # with non-trivial affine parameters.
    k1, k2, k3 = jax.random.split(jax.random.PRNGKey(1), 3)
    x2 = jax.random.normal(k1, (N, C, 10, 10), dtype=jnp.float32)
    w2 = jax.random.normal(k2, (1, C, 1, 1), dtype=jnp.float32)
    b2 = jax.random.normal(k3, (1, C, 1, 1), dtype=jnp.float32)
    out2 = jax.block_until_ready(group_norm(x2, w2, b2, num_groups=G))
    ref2 = group_norm_ref(x2, w2, b2, num_groups=G)
    assert jnp.allclose(out2, ref2, atol=1e-5, rtol=1e-5), "case 2 mismatch"

    # Case 3: force the two-phase fallback (path used when a whole group tile
    # cannot stay VMEM-resident, e.g. very large activations on v7x).
    out3 = jax.block_until_ready(
        group_norm(x, weight, bias, num_groups=G, vmem_budget_bytes=256 * 1024))
    assert jnp.allclose(out3, ref, atol=1e-5, rtol=1e-5), "case 3 mismatch"

    print("KERNEL_OK")
</pallas_src>

<mosaic_0001>
module attributes {stable_mosaic.version = 11 : i64} {
  func.func @_gn_fused_kernel(%arg0: i32, %arg1: i32, %arg2: memref<2x2x2x256xf32, #tpu.memory_space<vmem>>, %arg3: memref<2x2x1xf32, #tpu.memory_space<vmem>>, %arg4: memref<2x2x1xf32, #tpu.memory_space<vmem>>, %arg5: memref<2x2x2x256xf32, #tpu.memory_space<vmem>>) attributes {dimension_semantics = [#tpu.dimension_semantics<parallel>, #tpu.dimension_semantics<parallel>], iteration_bounds = array<i64: 1, 1>, scalar_prefetch = 0 : i64, scratch_operands = 0 : i64, tpu.core_type = #tpu.core_type<tc>, window_params = [{transform_indices = @transform_0, window_bounds = array<i64: 2, 2, 2, 256>}, {transform_indices = @transform_1, window_bounds = array<i64: 2, 2, 1>}, {transform_indices = @transform_2, window_bounds = array<i64: 2, 2, 1>}, {transform_indices = @transform_3, window_bounds = array<i64: 2, 2, 2, 256>}]} {
    %c0 = arith.constant 0 : index
    %c0_0 = arith.constant 0 : index
    %c0_1 = arith.constant 0 : index
    %c0_2 = arith.constant 0 : index
    %0 = vector.load %arg2[%c0, %c0_0, %c0_1, %c0_2] : memref<2x2x2x256xf32, #tpu.memory_space<vmem>>, vector<2x2x2x256xf32>
    %cst = arith.constant dense<0.000000e+00> : vector<2x2x2xf32>
    %1 = vector.multi_reduction <add>, %0, %cst [3] : vector<2x2x2x256xf32> to vector<2x2x2xf32>
    %2 = vector.shape_cast %1 : vector<2x2x2xf32> to vector<2x2x2x1xf32>
    %cst_3 = arith.constant dense<0.000000e+00> : vector<2x2x1xf32>
    %3 = vector.multi_reduction <add>, %2, %cst_3 [2] : vector<2x2x2x1xf32> to vector<2x2x1xf32>
    %4 = vector.shape_cast %3 : vector<2x2x1xf32> to vector<2x2x1x1xf32>
    %cst_4 = arith.constant 0.001953125 : f32
    %5 = vector.broadcast %cst_4 : f32 to vector<2x2x1x1xf32>
    %6 = arith.mulf %4, %5 : vector<2x2x1x1xf32>
    %7 = vector.broadcast %6 : vector<2x2x1x1xf32> to vector<2x2x2x256xf32>
    %8 = arith.subf %0, %7 : vector<2x2x2x256xf32>
    %9 = arith.mulf %8, %8 : vector<2x2x2x256xf32>
    %cst_5 = arith.constant dense<0.000000e+00> : vector<2x2x2xf32>
    %10 = vector.multi_reduction <add>, %9, %cst_5 [3] : vector<2x2x2x256xf32> to vector<2x2x2xf32>
    %11 = vector.shape_cast %10 : vector<2x2x2xf32> to vector<2x2x2x1xf32>
    %cst_6 = arith.constant dense<0.000000e+00> : vector<2x2x1xf32>
    %12 = vector.multi_reduction <add>, %11, %cst_6 [2] : vector<2x2x2x1xf32> to vector<2x2x1xf32>
    %13 = vector.shape_cast %12 : vector<2x2x1xf32> to vector<2x2x1x1xf32>
    %cst_7 = arith.constant 0.001953125 : f32
    %14 = vector.broadcast %cst_7 : f32 to vector<2x2x1x1xf32>
    %15 = arith.mulf %13, %14 : vector<2x2x1x1xf32>
    %cst_8 = arith.constant 9.99999974E-6 : f32
    %16 = vector.broadcast %cst_8 : f32 to vector<2x2x1x1xf32>
    %17 = arith.addf %15, %16 : vector<2x2x1x1xf32>
    %18 = math.rsqrt %17 : vector<2x2x1x1xf32>
    %c0_9 = arith.constant 0 : index
    %c0_10 = arith.constant 0 : index
    %c0_11 = arith.constant 0 : index
    %19 = vector.load %arg3[%c0_9, %c0_10, %c0_11] : memref<2x2x1xf32, #tpu.memory_space<vmem>>, vector<2x2x1xf32>
    %20 = vector.shape_cast %19 : vector<2x2x1xf32> to vector<1x2x2x1xf32>
    %c0_12 = arith.constant 0 : index
    %c0_13 = arith.constant 0 : index
    %c0_14 = arith.constant 0 : index
    %21 = vector.load %arg4[%c0_12, %c0_13, %c0_14] : memref<2x2x1xf32, #tpu.memory_space<vmem>>, vector<2x2x1xf32>
    %22 = vector.shape_cast %21 : vector<2x2x1xf32> to vector<1x2x2x1xf32>
    %23 = vector.broadcast %20 : vector<1x2x2x1xf32> to vector<2x2x2x1xf32>
    %24 = vector.broadcast %18 : vector<2x2x1x1xf32> to vector<2x2x2x1xf32>
    %25 = arith.mulf %23, %24 : vector<2x2x2x1xf32>
    %26 = vector.broadcast %25 : vector<2x2x2x1xf32> to vector<2x2x2x256xf32>
    %27 = arith.mulf %8, %26 : vector<2x2x2x256xf32>
    %28 = vector.broadcast %22 : vector<1x2x2x1xf32> to vector<2x2x2x256xf32>
    %29 = arith.addf %27, %28 : vector<2x2x2x256xf32>
    %c0_15 = arith.constant 0 : index
    %c0_16 = arith.constant 0 : index
    %c0_17 = arith.constant 0 : index
    %c0_18 = arith.constant 0 : index
    %30 = vector.load %arg5[%c0_15, %c0_16, %c0_17, %c0_18] : memref<2x2x2x256xf32, #tpu.memory_space<vmem>>, vector<2x2x2x256xf32>
    tpu.vector_store %arg5[%c0_15, %c0_16, %c0_17, %c0_18], %29 {strides = array<i32>} : memref<2x2x2x256xf32, #tpu.memory_space<vmem>>, vector<2x2x2x256xf32>,
    return
  }
  func.func @transform_0(%arg0: i32, %arg1: i32) -> (i32, i32, i32, i32) {
    %c0_i32 = arith.constant 0 : i32
    %c0_i32_0 = arith.constant 0 : i32
    %c0_i32_1 = arith.constant 0 : i32
    return %arg1, %arg0, %c0_i32, %c0_i32_0 : i32, i32, i32, i32
  }
  func.func @transform_1(%arg0: i32, %arg1: i32) -> (i32, i32, i32) {
    %c0_i32 = arith.constant 0 : i32
    %c0_i32_0 = arith.constant 0 : i32
    %c0_i32_1 = arith.constant 0 : i32
    return %arg0, %c0_i32, %c0_i32_0 : i32, i32, i32
  }
  func.func @transform_2(%arg0: i32, %arg1: i32) -> (i32, i32, i32) {
    %c0_i32 = arith.constant 0 : i32
    %c0_i32_0 = arith.constant 0 : i32
    %c0_i32_1 = arith.constant 0 : i32
    return %arg0, %c0_i32, %c0_i32_0 : i32, i32, i32
  }
  func.func @transform_3(%arg0: i32, %arg1: i32) -> (i32, i32, i32, i32) {
    %c0_i32 = arith.constant 0 : i32
    %c0_i32_0 = arith.constant 0 : i32
    %c0_i32_1 = arith.constant 0 : i32
    return %arg1, %arg0, %c0_i32, %c0_i32_0 : i32, i32, i32, i32
  }
}

</mosaic_0001>

<bundles_post_ra>
// kernel: tpu_custom_call.1
= control target key start
LH: loop header
LB: loop body
LE: loop exit
PB: predicated region body
PF: predicated region fallthrough
CT: control target
= control target key end

     0   :  { %8 = vsyncpa [#allocation3], 0  ;;  %s551_s0 = inlined_call_operand.hbm [shape: f32[2,2,2,256], index: 0, kind: input, shape index: {}]   ;;  %s552_s1 = inlined_call_operand.vmem [shape: f32[2,2,1], index: 1, kind: input, shape index: {}]   ;;  %s553_s2 = inlined_call_operand.vmem [shape: f32[2,2,1], index: 2, kind: input, shape index: {}]   ;;  %s554_s3 = inlined_call_operand.hbm [shape: f32[2,2,2,256], index: 3, kind: output, shape index: {}]  }
   0x1   :  { %9 = vsyncpa [#allocation4], 0  ;;  %s416_s12 = smov [#allocation2]   ;;  %s368_s16 = scalar_lea.hbm %s551_s0, 256 }
   0x2   :  { %s15_s13 = sshll.u32 %s416_s12, 4  ;;  %p369_p0 = scmp.ne.s32.totalorder %s551_s0, %s368_s16  ;;  %s16_s13 = int_to_ptr.vmem [resolvable:$true] %s15_s13 }
   0x3   :  { %p372_p1 = scmp.lt.u32.totalorder %s368_s16, %s551_s0 }
   0x5   :  { %p374_p2 = pnand %p372_p1, %p369_p0 }
   0x7   :  { %377 = shalt.err (!%p374_p2)
}
   0x8   :  { %s378_s21 = scalar_lea.vmem %s16_s13, 256  ;;  %p383_p4 = scmp.lt.s32.totalorder %s16_s13, %s16_s13 }
   0x9   :  { %p379_p3 = scmp.ne.s32.totalorder %s16_s13, %s378_s21  ;;  %p384_p5 = scmp.lt.s32.totalorder %s378_s21, %s378_s21 }
   0xb   :  { %p385_p6 = por %p384_p5, %p383_p4 }
   0xd   :  { %p386_p7 = pnand %p385_p6, %p379_p3 }
   0xf   :  { %389 = shalt.err (!%p386_p7)
}
  0x10   :  { %s417_s22 = smov 64   ;;  %s418_s23 = smov 4  }
  0x11   :  { %21 = dma.hbm_to_vmem [thread:$0]  %s551_s0, 256, %s16_s13, [#allocation3], %s417_s22, %s417_s22, %s418_s23  }
  0x12   :  { %412 = dma.done.wait [#allocation3], 256  }
  0x13   :  { %413 = vsyncadd [#allocation3], 4294967040  ;;  %v40_v0 = vlaneseq  ;;  %v419_v1 = vmov 1983009808   ;;  %vm77_vm0 = vcmask 1041408  }
  0x14   :  { %v38_v2 = vunpack.c.l.s4 %v419_v1  ;;  %v31_v6 = vld [vmem:[#allocation2 + $0x8] sm:$0xf]  ;;  %v29_v7 = vld [vmem:[#allocation2] sm:$0xf]  ;;  %v463_v8 = vld [vmem:[#allocation2 + $0xc] sm:$0xf] }
  0x15   :  { %v458_v3 = vshrl.u32 %v40_v0, 7  ;;  %v469_v12 = vld [vmem:[#allocation2 + $0x4] sm:$0xf] }
  0x16   :  { %v39_v4 = vunpack.c.0.s8 %v38_v2 }
  0x18   :  { %v461_v5 = vsub.s32 %v39_v4, %v458_v3 }
  0x1a   :  { %v59_v9 = vrot.slane %v31_v6, %v461_v5  ;;  %v43_v10 = vrot.slane %v29_v7, %v461_v5  ;;  %v67_v11 = vrot.slane %v463_v8, %v461_v5  ;;  %v51_v13 = vrot.slane %v469_v12, %v461_v5 }
  0x1c   :  { %v60_v14 = vcombine.high %v59_v9, %v59_v9  ;;  %v88_v15 = vsel %vm77_vm0, %v59_v9, 0.0  ;;  %v44_v16 = vcombine.high %v43_v10, %v43_v10  ;;  %v78_v17 = vsel %vm77_vm0, %v43_v10, 0.0 }
  0x1d   :  { %v68_v18 = vcombine.high %v67_v11, %v67_v11  ;;  %v52_v19 = vcombine.high %v51_v13, %v51_v13  ;;  %v93_v22 = vsel %vm77_vm0, %v67_v11, 0.0  ;;  %v83_v23 = vsel %vm77_vm0, %v51_v13, 0.0 }
  0x1e   :  { %v89_v20 = vsel %vm77_vm0, %v60_v14, 0.0  ;;  %v79_v21 = vsel %vm77_vm0, %v44_v16, 0.0 }
  0x1f   :  { %v90_v24 = vadd.f32 %v89_v20, %v88_v15  ;;  %v80_v25 = vadd.f32 %v79_v21, %v78_v17  ;;  %v94_v26 = vsel %vm77_vm0, %v68_v18, 0.0  ;;  %v84_v27 = vsel %vm77_vm0, %v52_v19, 0.0 }
  0x20   :  { %v95_v28 = vadd.f32 %v94_v26, %v93_v22  ;;  %v85_v29 = vadd.f32 %v84_v27, %v83_v23 }
  0x21   :  { %91 = vadd.xlane.f32.xlu1 %v90_v24  ;;  %81 = vadd.xlane.f32.xlu0 %v80_v25 }
  0x25   :  { %96 = vadd.xlane.f32.xlu1 %v95_v28  ;;  %86 = vadd.xlane.f32.xlu0 %v85_v29 }
  0xae   :  { %v92_v30 = vpop.xlane.xlu1 %91  ;;  %v82_v31 = vpop.xlane.xlu0 %81 }
  0xaf   :  { %v112_v32 = vsel %vm77_vm0, %v92_v30, 0.0  ;;  %v98_v33 = vsel %vm77_vm0, %v82_v31, 0.0  ;;  %v244_v31 = vld [vmem:[%s553_s2] sm:$0x3] }
  0xb0   :  { %v113_v34 = vrot.slane %v112_v32, 4  ;;  %v99_v35 = vrot.slane %v98_v33, 4 }
  0xb2   :  { %v114_v36 = vadd.f32 %v113_v34, %v112_v32  ;;  %v100_v37 = vadd.f32 %v99_v35, %v98_v33  ;;  %v97_v38 = vpop.xlane.xlu1 %96  ;;  %v87_v39 = vpop.xlane.xlu0 %86  ;;  %v420_v32 = vmov 0  }
  0xb3   :  { %v119_v40 = vsel %vm77_vm0, %v97_v38, 0.0  ;;  %v105_v41 = vsel %vm77_vm0, %v87_v39, 0.0  ;;  %359 = vset.pattern.permute.xlu1 %v420_v32  ;;  %358 = vset.pattern.permute.xlu0 %v420_v32 }
  0xb4   :  { %v115_v42 = vrot.slane %v114_v36, 2  ;;  %v101_v43 = vrot.slane %v100_v37, 2  ;;  %v120_v44 = vrot.slane %v119_v40, 4  ;;  %v106_v45 = vrot.slane %v105_v41, 4 }
  0xb6   :  { %v116_v46 = vadd.f32 %v115_v42, %v114_v36  ;;  %v102_v47 = vadd.f32 %v101_v43, %v100_v37  ;;  %v121_v48 = vadd.f32 %v120_v44, %v119_v40  ;;  %v107_v49 = vadd.f32 %v106_v45, %v105_v41 }
  0xb8   :  { %v117_v50 = vrot.slane %v116_v46, 1  ;;  %v103_v51 = vrot.slane %v102_v47, 1  ;;  %v122_v52 = vrot.slane %v121_v48, 2  ;;  %v108_v53 = vrot.slane %v107_v49, 2 }
  0xba   :  { %v118_v54 = vadd.f32 %v117_v50, %v116_v46  ;;  %v104_v55 = vadd.f32 %v103_v51, %v102_v47  ;;  %v123_v56 = vadd.f32 %v122_v52, %v121_v48  ;;  %v109_v57 = vadd.f32 %v108_v53, %v107_v49 }
  0xbc   :  { %v128_v58 = vmul.f32 0.001953125, %v118_v54  ;;  %v126_v59 = vmul.f32 0.001953125, %v104_v55  ;;  %v124_v60 = vrot.slane %v123_v56, 1  ;;  %v110_v61 = vrot.slane %v109_v57, 1 }
  0xbe   :  { %v485_v62 = vsub.f32 %v31_v6, %v128_v58  ;;  %v487_v63 = vsub.f32 %v29_v7, %v126_v59  ;;  %v125_v0 = vadd.f32 %v124_v60, %v123_v56  ;;  %v111_v1 = vadd.f32 %v110_v61, %v109_v57 }
  0xc0   :  { %v129_v2 = vmul.f32 0.001953125, %v125_v0  ;;  %v127_v4 = vmul.f32 0.001953125, %v111_v1  ;;  %v134_v9 = vmul.f32 %v487_v63, %v487_v63  ;;  %v136_v10 = vmul.f32 %v485_v62, %v485_v62 }
  0xc2   :  { %v494_v11 = vsub.f32 %v463_v8, %v129_v2  ;;  %v497_v13 = vsub.f32 %v469_v12, %v127_v4  ;;  %v148_v6 = vrot.slane %v134_v9, %v461_v5  ;;  %v164_v7 = vrot.slane %v136_v10, %v461_v5 }
  0xc4   :  { %v149_v14 = vcombine.high %v148_v6, %v148_v6  ;;  %v165_v15 = vcombine.high %v164_v7, %v164_v7  ;;  %v135_v16 = vmul.f32 %v497_v13, %v497_v13  ;;  %v137_v17 = vmul.f32 %v494_v11, %v494_v11 }
  0xc5   :  { %v182_v18 = vsel %vm77_vm0, %v148_v6, 0.0  ;;  %v192_v21 = vsel %vm77_vm0, %v164_v7, 0.0 }
  0xc6   :  { %v183_v8 = vsel %vm77_vm0, %v149_v14, 0.0  ;;  %v156_v12 = vrot.slane %v135_v16, %v461_v5  ;;  %v172_v20 = vrot.slane %v137_v17, %v461_v5  ;;  %v193_v22 = vsel %vm77_vm0, %v165_v15, 0.0  ;;  %v242_v17 = vld [vmem:[%s552_s1] sm:$0x3] }
  0xc7   :  { %v184_v19 = vadd.f32 %v183_v8, %v182_v18  ;;  %v194_v25 = vadd.f32 %v193_v22, %v192_v21 }
  0xc8   :  { %v157_v23 = vcombine.high %v156_v12, %v156_v12  ;;  %v173_v24 = vcombine.high %v172_v20, %v172_v20  ;;  %v187_v26 = vsel %vm77_vm0, %v156_v12, 0.0  ;;  %v197_v29 = vsel %vm77_vm0, %v172_v20, 0.0 }
  0xc9   :  { %185 = vadd.xlane.f32.xlu0 %v184_v19  ;;  %v243_v19 = vld [vmem:[%s552_s1 + $0x2] sm:$0x3]  ;;  %s422_s1 = smov [#allocation5]  }
  0xca   :  { %v188_v27 = vsel %vm77_vm0, %v157_v23, 0.0  ;;  %v198_v30 = vsel %vm77_vm0, %v173_v24, 0.0 }
  0xcb   :  { %v189_v28 = vadd.f32 %v188_v27, %v187_v26  ;;  %v199_v5 = vadd.f32 %v198_v30, %v197_v29  ;;  %v421_v26 = vmov 269488144  }
  0xcc   :  { %v267_v27 = vunpack.c.l.s4 %v421_v26 }
  0xcd   :  { %195 = vadd.xlane.f32.xlu0 %v194_v25  ;;  %190 = vadd.xlane.f32.xlu1 %v189_v28  ;;  %v245_v25 = vld [vmem:[%s553_s2 + $0x2] sm:$0x3]  ;;  %s339_s2 = sshll.u32 %s422_s1, 4  ;;  %s340_s2 = int_to_ptr.vmem [resolvable:$true] %s339_s2 }
  0xce   :  { %v268_v28 = vunpack.c.0.s8 %v267_v27  ;;  %s390_s6 = scalar_lea.vmem %s340_s2, 256  ;;  %p395_p9 = scmp.lt.s32.totalorder %s340_s2, %s340_s2 }
  0xcf   :  { %p391_p8 = scmp.ne.s32.totalorder %s340_s2, %s390_s6  ;;  %p396_p10 = scmp.lt.s32.totalorder %s390_s6, %s390_s6 }
  0xd0   :  { %v271_v29 = vsub.s32 %v268_v28, %v458_v3 }
  0xd1   :  { %200 = vadd.xlane.f32.xlu1 %v199_v5  ;;  %p397_p11 = por %p396_p10, %p395_p9 }
  0xd3   :  { %p398_p12 = pnand %p397_p11, %p391_p8 }
  0xe2   :  { %304 = vperm.xlu1 %359, %v244_v31  }
 0x156   :  { %v186_v33 = vpop.xlane.xlu0 %185 }
 0x157   :  { %v202_v34 = vsel %vm77_vm0, %v186_v33, 0.0 }
 0x158   :  { %v203_v35 = vrot.slane %v202_v34, 4 }
 0x15a   :  { %v204_v36 = vadd.f32 %v203_v35, %v202_v34  ;;  %v196_v37 = vpop.xlane.xlu0 %195  ;;  %v191_v38 = vpop.xlane.xlu1 %190 }
 0x15b   :  { %v216_v39 = vsel %vm77_vm0, %v196_v37, 0.0  ;;  %v209_v41 = vsel %vm77_vm0, %v191_v38, 0.0 }
 0x15c   :  { %v205_v40 = vrot.slane %v204_v36, 2  ;;  %v217_v42 = vrot.slane %v216_v39, 4  ;;  %v210_v43 = vrot.slane %v209_v41, 4 }
 0x15e   :  { %v206_v44 = vadd.f32 %v205_v40, %v204_v36  ;;  %v218_v45 = vadd.f32 %v217_v42, %v216_v39  ;;  %v211_v46 = vadd.f32 %v210_v43, %v209_v41  ;;  %v201_v47 = vpop.xlane.xlu1 %200 }
 0x15f   :  { %v223_v50 = vsel %vm77_vm0, %v201_v47, 0.0 }
 0x160   :  { %v207_v48 = vrot.slane %v206_v44, 1  ;;  %v219_v49 = vrot.slane %v218_v45, 2  ;;  %v212_v51 = vrot.slane %v211_v46, 2  ;;  %v224_v52 = vrot.slane %v223_v50, 4 }
 0x162   :  { %v208_v53 = vadd.f32 %v207_v48, %v206_v44  ;;  %v220_v54 = vadd.f32 %v219_v49, %v218_v45  ;;  %v213_v55 = vadd.f32 %v212_v51, %v211_v46  ;;  %v225_v56 = vadd.f32 %v224_v52, %v223_v50  ;;  %v305_v30 = vpop.permute.xlu1 %304 }
 0x163   :  { %v316_v32 = vrot.slane %v305_v30, %v271_v29 }
 0x164   :  { %v230_v57 = vmul.f32 0.001953125, %v208_v53  ;;  %v221_v58 = vrot.slane %v220_v54, 1  ;;  %v214_v59 = vrot.slane %v213_v55, 1  ;;  %v226_v60 = vrot.slane %v225_v56, 2 }
 0x166   :  { %v234_v61 = vadd.f32 1e-05, %v230_v57  ;;  %v222_v0 = vadd.f32 %v221_v58, %v220_v54  ;;  %v215_v1 = vadd.f32 %v214_v59, %v213_v55  ;;  %v227_v2 = vadd.f32 %v226_v60, %v225_v56 }
 0x168   :  { %360 = vrsqrt.f32 %v234_v61  ;;  %v232_v4 = vmul.f32 0.001953125, %v222_v0  ;;  %v231_v9 = vmul.f32 0.001953125, %v215_v1  ;;  %v228_v10 = vrot.slane %v227_v2, 1 }
 0x16a   :  { %v235_v6 = vadd.f32 1e-05, %v231_v9  ;;  %v236_v7 = vadd.f32 1e-05, %v232_v4  ;;  %v229_v14 = vadd.f32 %v228_v10, %v227_v2 }
 0x16c   :  { %362 = vrsqrt.f32 %v235_v6  ;;  %v233_v15 = vmul.f32 0.001953125, %v229_v14 }
 0x16d   :  { %364 = vrsqrt.f32 %v236_v7 }
 0x16e   :  { %v237_v16 = vadd.f32 1e-05, %v233_v15 }
 0x170   :  { %366 = vrsqrt.f32 %v237_v16 }
 0x172   :  { %v361_v18 = vpop.eup %360 }
 0x173   :  { %v246_v8 = vmul.f32 %v361_v18, %v242_v17 }
 0x175   :  { %252 = vperm.xlu0 %358, %v246_v8  }
 0x176   :  { %v363_v12 = vpop.eup %362 }
 0x177   :  { %v247_v20 = vmul.f32 %v363_v12, %v243_v19  ;;  %v365_v21 = vpop.eup %364 }
 0x178   :  { %v248_v22 = vmul.f32 %v365_v21, %v242_v17 }
 0x179   :  { %256 = vperm.xlu1 %359, %v247_v20  }
 0x17a   :  { %v367_v23 = vpop.eup %366 }
 0x17b   :  { %v249_v24 = vmul.f32 %v367_v23, %v243_v19 }
 0x17d   :  { %260 = vperm.xlu1 %359, %v248_v22  }
 0x181   :  { %264 = vperm.xlu1 %359, %v249_v24  }
 0x185   :  { %308 = vperm.xlu1 %359, %v245_v25  }
 0x1f4   :  { %v253_v5 = vpop.permute.xlu0 %252 }
 0x1f5   :  { %v272_v31 = vrot.slane %v253_v5, %v271_v29 }
 0x1f7   :  { %v298_v33 = vmul.f32 %v272_v31, %v487_v63 }
 0x1f8   :  { %v257_v35 = vpop.permute.xlu1 %256 }
 0x1f9   :  { %v326_v34 = vadd.f32 %v316_v32, %v298_v33  ;;  %v279_v40 = vrot.slane %v257_v35, %v271_v29 }
 0x1fb   :  { %330 = vst [vmem:[#allocation5] sm:$0xf] %v326_v34  ;;  %v299_v3 = vmul.f32 %v279_v40, %v497_v13 }
 0x1fc   :  { %v261_v36 = vpop.permute.xlu1 %260 }
 0x1fd   :  { %v286_v37 = vrot.slane %v261_v36, %v271_v29 }
 0x1ff   :  { %v300_v38 = vmul.f32 %v286_v37, %v485_v62 }
 0x200   :  { %v265_v39 = vpop.permute.xlu1 %264 }
 0x201   :  { %v328_v41 = vadd.f32 %v316_v32, %v300_v38  ;;  %v293_v42 = vrot.slane %v265_v39, %v271_v29 }
 0x203   :  { %332 = vst [vmem:[#allocation5 + $0x8] sm:$0xf] %v328_v41  ;;  %v301_v44 = vmul.f32 %v293_v42, %v494_v11 }
 0x204   :  { %v309_v43 = vpop.permute.xlu1 %308 }
 0x205   :  { %v323_v63 = vrot.slane %v309_v43, %v271_v29 }
 0x207   :  { %v327_v45 = vadd.f32 %v323_v63, %v299_v3  ;;  %v329_v46 = vadd.f32 %v323_v63, %v301_v44 }
 0x209   :  { %331 = vst [vmem:[#allocation5 + $0x4] sm:$0xf] %v327_v45  ;;  %333 = vst [vmem:[#allocation5 + $0xc] sm:$0xf] %v329_v46 }
 0x20a   :  { %401 = shalt.err (!%p398_p12)
}
 0x20b   :  { %s402_s9 = scalar_lea.hbm %s554_s3, 256 }
 0x20c   :  { %p403_p13 = scmp.ne.s32.totalorder %s554_s3, %s402_s9  ;;  %p406_p0 = scmp.lt.u32.totalorder %s402_s9, %s554_s3 }
 0x20e   :  { %p408_p1 = pnand %p406_p0, %p403_p13 }
 0x210   :  { %411 = shalt.err (!%p408_p1)
}
 0x211   :  { %345 = dma.vmem_to_hbm [thread:$0]  %s340_s2, 256, %s554_s3, [#allocation4], %s417_s22, %s417_s22, %s418_s23  }
 0x212   :  { %414 = dma.done.wait [#allocation4], 256  }
 0x213   :  { %415 = vsyncadd [#allocation4], 4294967040 }
 0x214   :  { %349 = vsyncpa [#allocation3], 1 }
 0x215   :  { %350 = vsyncpa [#allocation4], 1 }

</bundles_post_ra>
